<compile_context>
chip_gen: v5e
topology: v5e:2x2
jax: 0.10.0
libtpu: 0.0.40
codegen_flags: <defaults>
</compile_context>

<pallas_src>
import functools

import jax
import jax.numpy as jnp
from jax.experimental import pallas as pl
from jax.experimental.pallas import tpu as pltpu


def _round_up(x, m):
    return ((x + m - 1) // m) * m


def _patch_embed_kernel(p_ref, w_ref, b_ref, o_ref):
    # p_ref: (tm, K_p)  patch tile   (compute dtype, e.g. bf16)
    # w_ref: (K_p, te)  flattened conv-weight tile (transposed)
    # b_ref: (1, te)    bias tile (f32)
    # o_ref: (tm, te)   output tile
    acc = jnp.dot(p_ref[...], w_ref[...], preferred_element_type=jnp.float32)
    o_ref[...] = (acc + b_ref[...]).astype(o_ref.dtype)


def _choose_te(e_p):
    """Pick an E tile (multiple of 128) that divides the padded E."""
    if e_p <= 1024:
        return e_p
    for te in (1024, 512, 384, 256, 128):
        if e_p % te == 0:
            return te
    return 128  # unreachable: e_p is a multiple of 128


def _choose_tm(m, k_p, te, in_bytes, out_bytes, budget=16 * 1024 * 1024):
    """Largest row tile (<=512, multiple of 8) whose double-buffered blocks fit."""
    tm = min(512, _round_up(m, 8))
    while tm > 8:
        need = (2 * tm * k_p * in_bytes          # patch tile, double-buffered
                + 2 * k_p * te * in_bytes        # weight tile, double-buffered
                + 2 * tm * te * out_bytes)       # output tile, double-buffered
        if need <= budget:
            break
        tm = max(8, _round_up(tm // 2, 8))
    return tm


def patch_embed(x, weight, bias, patch_size, *, compute_dtype=jnp.bfloat16):
    """x: (B, C, H, W) NCHW.
    weight: (E, C, ph, pw) conv weight, bias: (E,) or None.
    Returns (B, N, E) with N = (H//ph)*(W//pw)."""
    B, C, H, W = x.shape
    E = weight.shape[0]
    ph, pw = patch_size
    Gh, Gw = H // ph, W // pw
    N = Gh * Gw
    K = C * ph * pw
    M = B * N
    out_dtype = x.dtype

    # Extract non-overlapping patches; feature order (C, ph, pw) matches
    # PyTorch's weight.reshape(E, C*ph*pw).  Cast to the compute dtype here so
    # the extra HBM pass moves half the bytes.
    # TODO(synk): fold this rearrange+cast into the pallas_call operand via
    # CompilerParams(allow_input_fusion=[True, ...]) or an in-kernel
    # (1, C, ph, W)-slab reorder to drop the extra HBM round-trip.
    patches = x.reshape(B, C, Gh, ph, Gw, pw)
    patches = patches.transpose(0, 2, 4, 1, 3, 5).reshape(M, K)
    patches = patches.astype(compute_dtype)

    w2d = weight.reshape(E, K).T.astype(compute_dtype)              # (K, E)
    if bias is None:
        bias = jnp.zeros((E,), dtype=jnp.float32)
    b2d = bias.astype(jnp.float32).reshape(1, E)

    # Lane-align the contraction and output dims; pad rows up to the row tile.
    K_p = _round_up(K, 128)
    E_p = _round_up(E, 128)
    in_bytes = jnp.dtype(compute_dtype).itemsize
    out_bytes = jnp.dtype(out_dtype).itemsize
    te = _choose_te(E_p)
    tm = _choose_tm(M, K_p, te, in_bytes, out_bytes)
    M_p = _round_up(M, tm)

    patches = jnp.pad(patches, ((0, M_p - M), (0, K_p - K)))
    w2d = jnp.pad(w2d, ((0, K_p - K), (0, E_p - E)))
    b2d = jnp.pad(b2d, ((0, 0), (0, E_p - E)))

    grid = (M_p // tm, E_p // te)

    cost = pl.CostEstimate(
        flops=2 * M_p * K_p * E_p,
        transcendentals=0,
        bytes_accessed=(M_p * K_p + K_p * E_p + E_p) * in_bytes
        + M_p * E_p * out_bytes,
    )

    out = pl.pallas_call(
        _patch_embed_kernel,
        out_shape=jax.ShapeDtypeStruct((M_p, E_p), out_dtype),
        grid_spec=pltpu.PrefetchScalarGridSpec(
            num_scalar_prefetch=0,
            grid=grid,
            in_specs=[
                pl.BlockSpec((tm, K_p), lambda i, j: (i, 0)),
                # Weight block index is constant along i; Mosaic skips re-DMA
                # of unchanged blocks, so it is effectively resident.
                pl.BlockSpec((K_p, te), lambda i, j: (0, j)),
                pl.BlockSpec((1, te), lambda i, j: (0, j)),
            ],
            out_specs=pl.BlockSpec((tm, te), lambda i, j: (i, j)),
        ),
        compiler_params=pltpu.CompilerParams(
            dimension_semantics=("parallel", "parallel"),
            vmem_limit_bytes=32 * 1024 * 1024,
        ),
        cost_estimate=cost,
    )(patches, w2d, b2d)

    out = out[:M, :E]
    return out.reshape(B, N, E)


def patch_embed_ref(x, weight, bias, patch_size):
    """Pure-JAX reference: strided conv via lax.conv_general_dilated."""
    y = jax.lax.conv_general_dilated(
        x, weight,
        window_strides=patch_size, padding="VALID",
        dimension_numbers=("NCHW", "OIHW", "NCHW"))
    if bias is not None:
        y = y + bias[None, :, None, None]
    B, E, Gh, Gw = y.shape
    return y.reshape(B, E, Gh * Gw).transpose(0, 2, 1)


if __name__ == "__main__":
    # Module config (small, consistent with the forward):
    img_size = (16, 16)
    patch_size = (4, 4)
    in_chans = 4
    embed_dim = 32
    use_bias = True
    B = 2

    key = jax.random.PRNGKey(0)
    kx, kw, kb = jax.random.split(key, 3)

    x = jax.random.normal(kx, (B, in_chans, *img_size), dtype=jnp.float32)
    weight = 0.02 * jax.random.normal(
        kw, (embed_dim, in_chans, *patch_size), dtype=jnp.float32)
    bias = 0.01 * jax.random.normal(kb, (embed_dim,), dtype=jnp.float32) \
        if use_bias else None

    N = (img_size[0] // patch_size[0]) * (img_size[1] // patch_size[1])
    ref = patch_embed_ref(x, weight, bias, patch_size)

    # f32 compute path: exact-ish match against the conv reference.
    out_f32 = jax.block_until_ready(
        patch_embed(x, weight, bias, patch_size, compute_dtype=jnp.float32))
    assert out_f32.shape == (B, N, embed_dim)
    assert jnp.allclose(out_f32, ref, atol=1e-4, rtol=1e-4), \
        f"f32 max err {jnp.max(jnp.abs(out_f32 - ref))}"

    # Default bf16 operands (f32 MXU accumulation): loosened tolerance.
    out = jax.block_until_ready(patch_embed(x, weight, bias, patch_size))
    assert out.shape == (B, N, embed_dim)
    err = jnp.max(jnp.abs(out - ref))
    assert err < 2e-2, f"bf16 max err {err}"

    print("KERNEL_OK")
</pallas_src>

<mosaic_0001>
module attributes {stable_mosaic.version = 11 : i64} {
  func.func @_patch_embed_kernel(%arg0: i32, %arg1: i32, %arg2: memref<32x128xf32, #tpu.memory_space<vmem>>, %arg3: memref<128x128xf32, #tpu.memory_space<vmem>>, %arg4: memref<1x128xf32, #tpu.memory_space<vmem>>, %arg5: memref<32x128xf32, #tpu.memory_space<vmem>>) attributes {dimension_semantics = [#tpu.dimension_semantics<parallel>, #tpu.dimension_semantics<parallel>], iteration_bounds = array<i64: 1, 1>, scalar_prefetch = 0 : i64, scratch_operands = 0 : i64, tpu.core_type = #tpu.core_type<tc>, window_params = [{transform_indices = @transform_0, window_bounds = array<i64: 32, 128>}, {transform_indices = @transform_1, window_bounds = array<i64: 128, 128>}, {transform_indices = @transform_2, window_bounds = array<i64: 1, 128>}, {transform_indices = @transform_3, window_bounds = array<i64: 32, 128>}]} {
    %c0 = arith.constant 0 : index
    %c0_0 = arith.constant 0 : index
    %0 = vector.load %arg2[%c0, %c0_0] : memref<32x128xf32, #tpu.memory_space<vmem>>, vector<32x128xf32>
    %c0_1 = arith.constant 0 : index
    %c0_2 = arith.constant 0 : index
    %1 = vector.load %arg3[%c0_1, %c0_2] : memref<128x128xf32, #tpu.memory_space<vmem>>, vector<128x128xf32>
    %cst = arith.constant dense<0.000000e+00> : vector<32x128xf32>
    %2 = tpu.matmul %0, %1, %cst {dimension_numbers = #tpu.dot_dimension_numbers<[1], [0], [0], [1], [0, 0, 1, 1], [], []>} : vector<32x128xf32>, vector<128x128xf32>, vector<32x128xf32> -> vector<32x128xf32>
    %c0_3 = arith.constant 0 : index
    %c0_4 = arith.constant 0 : index
    %3 = vector.load %arg4[%c0_3, %c0_4] : memref<1x128xf32, #tpu.memory_space<vmem>>, vector<1x128xf32>
    %4 = vector.broadcast %3 : vector<1x128xf32> to vector<32x128xf32>
    %5 = arith.addf %2, %4 : vector<32x128xf32>
    %c0_5 = arith.constant 0 : index
    %c0_6 = arith.constant 0 : index
    %6 = vector.load %arg5[%c0_5, %c0_6] : memref<32x128xf32, #tpu.memory_space<vmem>>, vector<32x128xf32>
    tpu.vector_store %arg5[%c0_5, %c0_6], %5 {strides = array<i32>} : memref<32x128xf32, #tpu.memory_space<vmem>>, vector<32x128xf32>,
    return
  }
  func.func @transform_0(%arg0: i32, %arg1: i32) -> (i32, i32) {
    %c0_i32 = arith.constant 0 : i32
    %c0_i32_0 = arith.constant 0 : i32
    return %arg0, %c0_i32 : i32, i32
  }
  func.func @transform_1(%arg0: i32, %arg1: i32) -> (i32, i32) {
    %c0_i32 = arith.constant 0 : i32
    %c0_i32_0 = arith.constant 0 : i32
    return %c0_i32, %arg1 : i32, i32
  }
  func.func @transform_2(%arg0: i32, %arg1: i32) -> (i32, i32) {
    %c0_i32 = arith.constant 0 : i32
    %c0_i32_0 = arith.constant 0 : i32
    return %c0_i32, %arg1 : i32, i32
  }
  func.func @transform_3(%arg0: i32, %arg1: i32) -> (i32, i32) {
    %c0_i32 = arith.constant 0 : i32
    return %arg0, %arg1 : i32, i32
  }
}

</mosaic_0001>

<bundles_post_ra>
// kernel: tpu_custom_call.1
= control target key start
LH: loop header
LB: loop body
LE: loop exit
PB: predicated region body
PF: predicated region fallthrough
CT: control target
= control target key end

     0   :  { %8 = vsyncpa [#allocation3], 0  ;;  %s302_s0 = inlined_call_operand.hbm [shape: f32[32,128], index: 0, kind: input, shape index: {}]   ;;  %s303_s1 = inlined_call_operand.hbm [shape: f32[128,128], index: 1, kind: input, shape index: {}]   ;;  %s304_s2 = inlined_call_operand.vmem [shape: f32[1,128], index: 2, kind: input, shape index: {}]   ;;  %s305_s3 = inlined_call_operand.hbm [shape: f32[32,128], index: 3, kind: output, shape index: {}]  }
   0x1   :  { %9 = vsyncpa [#allocation6], 0 }
   0x2   :  { %10 = vsyncpa [#allocation4], 0  ;;  %s15_s14 = sshll.u32 %s302_s0, 4  ;;  %s256_s15 = smov [#allocation2]   ;;  %s16_s14 = int_to_ptr.hbm [resolvable:$true] %s15_s14 }
   0x3   :  { %s17_s16 = sshll.u32 %s256_s15, 4  ;;  %s28_s19 = sshll.u32 %s303_s1, 4  ;;  %s18_s16 = int_to_ptr.vmem [resolvable:$true] %s17_s16  ;;  %s29_s19 = int_to_ptr.hbm [resolvable:$true] %s28_s19 }
   0x4   :  { %s257_s20 = smov 128   ;;  %s258_s21 = smov 8  }
   0x5   :  { %23 = dma.hbm_to_vmem [thread:$0]  %s16_s14, 512, %s18_s16, [#allocation3], %s257_s20, %s257_s20, %s258_s21  }
   0x6   :  { %s259_s22 = smov [#allocation5]  }
   0x7   :  { %s30_s23 = sshll.u32 %s259_s22, 4  ;;  %s31_s23 = int_to_ptr.vmem [resolvable:$true] %s30_s23 }
   0x8   :  { %36 = dma.hbm_to_vmem [thread:$0]  %s29_s19, 2048, %s31_s23, [#allocation6], %s257_s20, %s257_s20, %s258_s21  }
   0x9   :  { %250 = dma.done.wait [#allocation3], 512  }
   0xa   :  { %251 = vsyncadd [#allocation3], 4294966784 }
   0xb   :  { %252 = dma.done.wait [#allocation6], 2048  }
   0xc   :  { %253 = vsyncadd [#allocation6], 4294965248  ;;  %v66_v0 = vld [vmem:[#allocation5 + $0x78] sm:$0xff]  ;;  %v65_v1 = vld [vmem:[#allocation5 + $0x70] sm:$0xff]  ;;  %s260_s24 = smov [#allocation7]   ;;  %s110_s28 = sshll.u32 %s305_s3, 4  ;;  %s111_s28 = int_to_ptr.hbm [resolvable:$true] %s110_s28 }
   0xd   :  { %125 = vmatpush.msra.mxu2 %v66_v0  ;;  %126 = vmatpush.msra.mxu3 %v66_v0  ;;  %v64_v2 = vld [vmem:[#allocation5 + $0x68] sm:$0xff]  ;;  %v63_v3 = vld [vmem:[#allocation5 + $0x60] sm:$0xff]  ;;  %v62_v4 = vld [vmem:[#allocation5 + $0x58] sm:$0xff]  ;;  %s108_s25 = sshll.u32 %s260_s24, 4  ;;  %s109_s25 = int_to_ptr.vmem [resolvable:$true] %s108_s25 }
   0xe   :  { %71 = vmatpush.msra.mxu0 %v66_v0  ;;  %124 = vmatpush.msra.mxu1 %v66_v0  ;;  %v61_v5 = vld [vmem:[#allocation5 + $0x50] sm:$0xff]  ;;  %v60_v6 = vld [vmem:[#allocation5 + $0x48] sm:$0xff]  ;;  %v59_v7 = vld [vmem:[#allocation5 + $0x40] sm:$0xff] }
   0xf   :  { %128 = vmatpush.msra.mxu2 %v65_v1  ;;  %129 = vmatpush.msra.mxu3 %v65_v1  ;;  %v58_v8 = vld [vmem:[#allocation5 + $0x38] sm:$0xff]  ;;  %v57_v9 = vld [vmem:[#allocation5 + $0x30] sm:$0xff]  ;;  %v56_v10 = vld [vmem:[#allocation5 + $0x28] sm:$0xff] }
  0x10   :  { %72 = vmatpush.msra.mxu0 %v65_v1  ;;  %127 = vmatpush.msra.mxu1 %v65_v1  ;;  %v55_v11 = vld [vmem:[#allocation5 + $0x20] sm:$0xff]  ;;  %v54_v12 = vld [vmem:[#allocation5 + $0x18] sm:$0xff]  ;;  %v53_v13 = vld [vmem:[#allocation5 + $0x10] sm:$0xff] }
  0x11   :  { %131 = vmatpush.msra.mxu2 %v64_v2  ;;  %132 = vmatpush.msra.mxu3 %v64_v2  ;;  %v52_v14 = vld [vmem:[#allocation5 + $0x8] sm:$0xff]  ;;  %v51_v15 = vld [vmem:[#allocation5] sm:$0xff]  ;;  %v49_v16 = vld [vmem:[#allocation2 + $0x10] sm:$0xff] }
  0x12   :  { %73 = vmatpush.msra.mxu0 %v64_v2  ;;  %130 = vmatpush.msra.mxu1 %v64_v2  ;;  %v50_v17 = vld [vmem:[#allocation2 + $0x18] sm:$0xff]  ;;  %v47_v18 = vld [vmem:[#allocation2] sm:$0xff]  ;;  %v48_v19 = vld [vmem:[#allocation2 + $0x8] sm:$0xff] }
  0x13   :  { %134 = vmatpush.msra.mxu2 %v63_v3  ;;  %135 = vmatpush.msra.mxu3 %v63_v3  ;;  %v177_v20 = vld [vmem:[%s304_s2] ss:$0 sm:$0xff] }
  0x14   :  { %74 = vmatpush.msra.mxu0 %v63_v3  ;;  %133 = vmatpush.msra.mxu1 %v63_v3 }
  0x15   :  { %137 = vmatpush.msra.mxu2 %v62_v4  ;;  %138 = vmatpush.msra.mxu3 %v62_v4 }
  0x16   :  { %75 = vmatpush.msra.mxu0 %v62_v4  ;;  %136 = vmatpush.msra.mxu1 %v62_v4 }
  0x17   :  { %140 = vmatpush.msra.mxu2 %v61_v5  ;;  %141 = vmatpush.msra.mxu3 %v61_v5 }
  0x18   :  { %76 = vmatpush.msra.mxu0 %v61_v5  ;;  %139 = vmatpush.msra.mxu1 %v61_v5 }
  0x19   :  { %143 = vmatpush.msra.mxu2 %v60_v6  ;;  %144 = vmatpush.msra.mxu3 %v60_v6 }
  0x1a   :  { %77 = vmatpush.msra.mxu0 %v60_v6  ;;  %142 = vmatpush.msra.mxu1 %v60_v6 }
  0x1b   :  { %146 = vmatpush.msra.mxu2 %v59_v7  ;;  %147 = vmatpush.msra.mxu3 %v59_v7 }
  0x1c   :  { %78 = vmatpush.msra.mxu0 %v59_v7  ;;  %145 = vmatpush.msra.mxu1 %v59_v7 }
  0x1d   :  { %149 = vmatpush.msra.mxu2 %v58_v8  ;;  %150 = vmatpush.msra.mxu3 %v58_v8 }
  0x1e   :  { %79 = vmatpush.msra.mxu0 %v58_v8  ;;  %148 = vmatpush.msra.mxu1 %v58_v8 }
  0x1f   :  { %152 = vmatpush.msra.mxu2 %v57_v9  ;;  %153 = vmatpush.msra.mxu3 %v57_v9 }
  0x20   :  { %80 = vmatpush.msra.mxu0 %v57_v9  ;;  %151 = vmatpush.msra.mxu1 %v57_v9 }
  0x21   :  { %155 = vmatpush.msra.mxu2 %v56_v10  ;;  %156 = vmatpush.msra.mxu3 %v56_v10 }
  0x22   :  { %81 = vmatpush.msra.mxu0 %v56_v10  ;;  %154 = vmatpush.msra.mxu1 %v56_v10 }
  0x23   :  { %158 = vmatpush.msra.mxu2 %v55_v11  ;;  %159 = vmatpush.msra.mxu3 %v55_v11 }
  0x24   :  { %82 = vmatpush.msra.mxu0 %v55_v11  ;;  %157 = vmatpush.msra.mxu1 %v55_v11 }
  0x25   :  { %161 = vmatpush.msra.mxu2 %v54_v12  ;;  %162 = vmatpush.msra.mxu3 %v54_v12 }
  0x26   :  { %83 = vmatpush.msra.mxu0 %v54_v12  ;;  %160 = vmatpush.msra.mxu1 %v54_v12 }
  0x27   :  { %164 = vmatpush.msra.mxu2 %v53_v13  ;;  %165 = vmatpush.msra.mxu3 %v53_v13 }
  0x28   :  { %84 = vmatpush.msra.mxu0 %v53_v13  ;;  %163 = vmatpush.msra.mxu1 %v53_v13 }
  0x29   :  { %167 = vmatpush.msra.mxu2 %v52_v14  ;;  %168 = vmatpush.msra.mxu3 %v52_v14 }
  0x2a   :  { %85 = vmatpush.msra.mxu0 %v52_v14  ;;  %166 = vmatpush.msra.mxu1 %v52_v14 }
  0x2b   :  { %170 = vmatpush.msra.mxu2 %v51_v15  ;;  %171 = vmatpush.msra.mxu3 %v51_v15 }
  0x2c   :  { %93 = vmatmul.f32.vlgmr.msra.gmra.mxu2 %v49_v16  ;;  %96 = vmatmul.f32.vlgmr.msra.gmra.mxu3 %v50_v17 }
  0x2d   :  { %86 = vmatpush.msra.mxu0 %v51_v15  ;;  %169 = vmatpush.msra.mxu1 %v51_v15 }
  0x2e   :  { %87 = vmatmul.f32.vlgmr.msra.gmra.mxu0 %v47_v18  ;;  %90 = vmatmul.f32.vlgmr.msra.gmra.mxu1 %v48_v19 }
  0xab   :  { %v88_v21 = vpop.f32.mrf.mxu0  ;;  %v91_v22 = vpop.f32.mrf.mxu1 }
  0xac   :  { %v89_v23 = vadd.f32 %v177_v20, %v88_v21  ;;  %v92_v24 = vadd.f32 %v177_v20, %v91_v22 }
  0xae   :  { %100 = vst [vmem:[#allocation7] sm:$0xff] %v89_v23 }
  0xaf   :  { %101 = vst [vmem:[#allocation7 + $0x8] sm:$0xff] %v92_v24  ;;  %v94_v25 = vpop.f32.mrf.mxu2  ;;  %v97_v26 = vpop.f32.mrf.mxu3 }
  0xb0   :  { %v95_v27 = vadd.f32 %v177_v20, %v94_v25  ;;  %v98_v28 = vadd.f32 %v177_v20, %v97_v26 }
  0xb2   :  { %102 = vst [vmem:[#allocation7 + $0x10] sm:$0xff] %v95_v27 }
  0xb3   :  { %103 = vst [vmem:[#allocation7 + $0x18] sm:$0xff] %v98_v28 }
  0xb4   :  { %116 = dma.vmem_to_hbm [thread:$0]  %s109_s25, 512, %s111_s28, [#allocation4], %s257_s20, %s257_s20, %s258_s21  }
  0xb5   :  { %254 = dma.done.wait [#allocation4], 512  }
  0xb6   :  { %255 = vsyncadd [#allocation4], 4294966784 }
  0xb7   :  { %121 = vsyncpa [#allocation3], 1 }
  0xb8   :  { %122 = vsyncpa [#allocation6], 1 }
  0xb9   :  { %123 = vsyncpa [#allocation4], 1 }

</bundles_post_ra>
